<compile_context>
chip_gen: v7x
topology: tpu7x:2x2x1
jax: 0.10.0
libtpu: 0.0.40
codegen_flags: <defaults>
</compile_context>

<pallas_src>
import jax
import jax.numpy as jnp
from jax.experimental import pallas as pl
from jax.experimental.pallas import tpu as pltpu

_LANES = 128


def _round_up(v, m):
    return ((v + m - 1) // m) * m


def _vmem_capacity_bytes():
    """Physical VMEM capacity of the attached chip (conservative fallback)."""
    try:
        cap = int(pltpu.get_tpu_info().vmem_capacity_bytes)
        if cap > 0:
            return cap
    except Exception:
        pass
    return 64 << 20  # v7x per-core capacity: safe lower bound everywhere


def _num_tensorcores():
    """TensorCores per device if discoverable; 1 otherwise (v5e/v6e)."""
    try:
        dev = jax.devices()[0]
        for attr in ("num_cores", "core_count"):
            v = getattr(dev, attr, None)
            if isinstance(v, int) and v > 0:
                return v
    except Exception:
        pass
    return 1


def _select_config(B, N, Fin, Fout, Fpad, itemsize, out_itemsize, vmem_cap,
                   num_cores, support_first, block_b, block_n, x_resident):
    """Pick (tb, tn, n_pad, x_resident, adj_bufs, vmem_est) VMEM-aware."""
    budget = max(8 << 20, int(vmem_cap * 0.45))   # per-step working-set budget

    # ---- node tile (pad N up to it instead of falling back to tn = N) ----
    if block_n is not None:
        tn = int(block_n)
    elif N <= 1024:
        tn = N
    else:
        best = None
        for cand in (1024, 896, 768, 640, 512, 384, 256, 128):
            key = (_round_up(N, cand), -cand)     # least padding, then largest
            if best is None or key < best[0]:
                best = (key, cand)
        tn = best[1]
    n_pad = _round_up(N, tn)

    acc_lanes = Fpad if support_first else _round_up(max(Fin, 1), _LANES)
    fin_lanes = _round_up(max(Fin, 1), _LANES)    # VMEM lane padding of x
    out_lanes = _round_up(Fout, _LANES)

    def footprint(tb, resident, adj_bufs):
        f = adj_bufs * tb * tn * tn * itemsize                  # adj stream
        if resident:
            f += 2 * tb * n_pad * fin_lanes * itemsize          # resident x
        else:
            f += 4 * tb * tn * fin_lanes * itemsize             # xc + xr streams
        f += 2 * tb * tn * out_lanes * out_itemsize             # output blocks
        f += tb * tn * acc_lanes * 4                            # f32 accumulator
        f += 4 * Fin * Fpad * itemsize + 6 * Fpad * 4           # weights + LN params
        return f

    divisors = [d for d in range(1, B + 1) if B % d == 0]
    adj_slab_cap = min(16 << 20, budget // 2)

    def pick_tb(resident, adj_bufs):
        for tb in sorted(divisors, reverse=True):
            if tb > 1 and tb * tn * tn * itemsize > adj_slab_cap:
                continue
            if footprint(tb, resident, adj_bufs) <= budget:
                return tb
        return None

    if block_b is not None:
        tb = int(block_b)
        assert B % tb == 0, "block_b must divide the batch size"
        if x_resident is None:
            x_resident = footprint(tb, True, 2) <= budget
        resident = bool(x_resident)
    else:
        prefer_resident = True if x_resident is None else bool(x_resident)
        tb = pick_tb(prefer_resident, 2)
        resident = prefer_resident
        if tb is None and prefer_resident and x_resident is None:
            tb = pick_tb(False, 2)
            resident = False
        if tb is None:
            tb, resident = 1, False
        # Split the batch tile only when the chip actually has >1 TensorCore
        # and the parallel axes would otherwise have a single grid step.
        if num_cores >= 2:
            steps = (B // tb) * (n_pad // tn)
            if steps < num_cores and tb > 1:
                want = max(1, B // num_cores)
                tb = max(d for d in divisors if d <= want)

    adj_bufs = 2
    total_steps = (B // tb) * (n_pad // tn) * (n_pad // tn)
    if total_steps > 2 and footprint(tb, resident, 3) <= budget:
        adj_bufs = 3                                     # deeper adj prefetch

    return tb, tn, n_pad, resident, adj_bufs, footprint(tb, resident, adj_bufs)


def _adj_block_spec(shape, index_map, bufs):
    """adj BlockSpec with optional deeper pipelining (graceful fallback)."""
    if bufs != 2:
        try:
            return pl.BlockSpec(shape, index_map, pipeline_mode=pl.Buffered(bufs))
        except Exception:
            pass
    return pl.BlockSpec(shape, index_map)


def _make_kernel(tb, tn, n_ct, fin, fout, fpad, compute_dtype, eps,
                 support_first, x_resident):
    f32 = jnp.float32
    rows = tb * tn

    def _slice_start(idx):
        s = idx * tn
        if tn % 128 == 0:
            s = pl.multiple_of(s, 128)
        elif tn % 8 == 0:
            s = pl.multiple_of(s, 8)
        return s

    def _step(adj_tile, xc, w_ref, acc_ref):
        if support_first:
            # support = x_col @ W (tiny K=fin matmul), lane-dense accumulation.
            support = jnp.einsum("bmf,fo->bmo", xc, w_ref[...],
                                 preferred_element_type=f32)
            support = support.astype(compute_dtype)
            acc_ref[...] += jnp.einsum("bnm,bmo->bno", adj_tile, support,
                                       preferred_element_type=f32)
        else:
            # Reassociated form: aggregate at depth fin, project in finalize.
            acc_ref[...] += jnp.einsum("bnm,bmf->bnf", adj_tile, xc,
                                       preferred_element_type=f32)

    def _finalize(xr, w_ref, wr_ref, b_ref, g_ref, be_ref, o_ref, acc_ref):
        xr2 = xr.reshape(rows, fin)
        res = jnp.dot(xr2, wr_ref[...], preferred_element_type=f32)   # (rows, fpad)
        if support_first:
            out = acc_ref[...].reshape(rows, fpad) + res + b_ref[...]
        else:
            agg = acc_ref[...].astype(compute_dtype).reshape(rows, fin)
            out = (jnp.dot(agg, w_ref[...], preferred_element_type=f32)
                   + res + b_ref[...])
        # LayerNorm over the fout real features (padded lanes masked on both
        # the mean and the variance terms).
        inv_f = 1.0 / fout
        if fpad != fout:
            mask = (jax.lax.broadcasted_iota(jnp.int32, (1, fpad), 1)
                    < fout).astype(f32)
            out = out * mask
        mean = jnp.sum(out, axis=-1, keepdims=True) * inv_f
        centered = out - mean
        if fpad != fout:
            centered = centered * mask
        var = jnp.sum(centered * centered, axis=-1, keepdims=True) * inv_f
        y = centered * jax.lax.rsqrt(var + eps)
        y = y * g_ref[...] + be_ref[...]
        # Unpadded, lane-sliced store: only fout features hit HBM.
        o_ref[...] = y[:, :fout].reshape(tb, tn, fout).astype(o_ref.dtype)

    if x_resident:
        def kernel(adj_ref, x_ref, w_ref, wr_ref, b_ref, g_ref, be_ref,
                   o_ref, acc_ref):
            c = pl.program_id(2)

            @pl.when(c == 0)
            def _():
                acc_ref[...] = jnp.zeros_like(acc_ref)

            if n_ct == 1:
                xc = x_ref[...]
            else:
                xc = x_ref[:, pl.ds(_slice_start(c), tn), :]
            _step(adj_ref[...], xc, w_ref, acc_ref)

            @pl.when(c == pl.num_programs(2) - 1)
            def _():
                if n_ct == 1:
                    xr = x_ref[...]
                else:
                    xr = x_ref[:, pl.ds(_slice_start(pl.program_id(1)), tn), :]
                _finalize(xr, w_ref, wr_ref, b_ref, g_ref, be_ref, o_ref, acc_ref)
    else:
        def kernel(adj_ref, xc_ref, xr_ref, w_ref, wr_ref, b_ref, g_ref, be_ref,
                   o_ref, acc_ref):
            c = pl.program_id(2)

            @pl.when(c == 0)
            def _():
                acc_ref[...] = jnp.zeros_like(acc_ref)

            _step(adj_ref[...], xc_ref[...], w_ref, acc_ref)

            @pl.when(c == pl.num_programs(2) - 1)
            def _():
                _finalize(xr_ref[...], w_ref, wr_ref, b_ref, g_ref, be_ref,
                          o_ref, acc_ref)

    return kernel


def enhanced_graph_conv(x, adj, weight, bias, wres_t, gamma, beta, *,
                        compute_dtype=jnp.bfloat16, out_dtype=jnp.float32,
                        eps=1e-5, block_b=None, block_n=None,
                        support_first=None, x_resident=None):
    """x: (B, N, Fin), adj: (B, N, N) -> (B, N, Fout) in out_dtype."""
    B, N, Fin = x.shape
    Fout = weight.shape[1]
    Fpad = _round_up(Fout, _LANES)
    itemsize = jnp.dtype(compute_dtype).itemsize
    out_itemsize = jnp.dtype(out_dtype).itemsize

    # Algorithm choice per MXU output-pass count (256-wide on v6e/v7x):
    # reassociating (aggregate at depth Fin first) only helps when it reduces
    # the number of MXU output passes on the N^2-scale matmul.
    if support_first is None:
        support_first = -(-Fpad // 256) <= -(-max(Fin, 1) // 256)

    vmem_cap = _vmem_capacity_bytes()
    num_cores = _num_tensorcores()
    tb, tn, n_pad, x_res, adj_bufs, vmem_est = _select_config(
        B, N, Fin, Fout, Fpad, itemsize, out_itemsize, vmem_cap, num_cores,
        support_first, block_b, block_n, x_resident)
    assert B % tb == 0 and n_pad % tn == 0
    n_ct = n_pad // tn

    # Pad the node axis (zero rows/cols contribute nothing; sliced away below).
    if n_pad != N:
        x = jnp.pad(x, ((0, 0), (0, n_pad - N), (0, 0)))
        adj = jnp.pad(adj, ((0, 0), (0, n_pad - N), (0, n_pad - N)))

    x_c = x.astype(compute_dtype)
    adj_c = adj.astype(compute_dtype)
    w_p = jnp.pad(weight, ((0, 0), (0, Fpad - Fout))).astype(compute_dtype)
    wr_p = jnp.pad(wres_t, ((0, 0), (0, Fpad - Fout))).astype(compute_dtype)
    bias_p = jnp.pad(bias, (0, Fpad - Fout)).reshape(1, Fpad).astype(jnp.float32)
    gamma_p = jnp.pad(gamma, (0, Fpad - Fout)).reshape(1, Fpad).astype(jnp.float32)
    beta_p = jnp.pad(beta, (0, Fpad - Fout)).reshape(1, Fpad).astype(jnp.float32)

    grid = (B // tb, n_ct, n_ct)   # (batch tiles, row tiles, col/reduction)
    kernel = _make_kernel(tb, tn, n_ct, Fin, Fout, Fpad, compute_dtype, eps,
                          support_first, x_res)

    adj_spec = _adj_block_spec((tb, tn, tn), lambda b, r, c: (b, r, c), adj_bufs)
    if x_res:
        x_specs = [pl.BlockSpec((tb, n_pad, Fin), lambda b, r, c: (b, 0, 0))]
        x_args = (x_c,)
    else:
        x_specs = [pl.BlockSpec((tb, tn, Fin), lambda b, r, c: (b, c, 0)),
                   pl.BlockSpec((tb, tn, Fin), lambda b, r, c: (b, r, 0))]
        x_args = (x_c, x_c)
    param_specs = [
        pl.BlockSpec((Fin, Fpad), lambda b, r, c: (0, 0)),   # W (lane-padded)
        pl.BlockSpec((Fin, Fpad), lambda b, r, c: (0, 0)),   # Wres (lane-padded)
        pl.BlockSpec((1, Fpad), lambda b, r, c: (0, 0)),     # bias
        pl.BlockSpec((1, Fpad), lambda b, r, c: (0, 0)),     # LN gamma
        pl.BlockSpec((1, Fpad), lambda b, r, c: (0, 0)),     # LN beta
    ]
    out_spec = pl.BlockSpec((tb, tn, Fout), lambda b, r, c: (b, r, 0))
    acc_lanes = Fpad if support_first else Fin

    grid_spec = pltpu.PrefetchScalarGridSpec(
        num_scalar_prefetch=0,
        grid=grid,
        in_specs=[adj_spec] + x_specs + param_specs,
        out_specs=out_spec,
        scratch_shapes=[pltpu.VMEM((tb, tn, acc_lanes), jnp.float32)],
    )

    # Cost estimate reflecting the actual streams.
    main_width = Fpad if support_first else Fin
    flops = 2 * B * n_pad * n_pad * main_width          # aggregation matmul
    flops += 2 * B * n_pad * Fin * Fpad                 # residual projection
    if support_first:
        flops += 2 * B * n_pad * Fin * Fpad * n_ct      # support per row tile
    else:
        flops += 2 * B * n_pad * Fin * Fpad             # finalize projection
    x_bytes = B * n_pad * Fin * itemsize
    if not x_res:
        x_bytes *= (n_ct + 1)                           # xc re-reads + xr
    bytes_accessed = (B * n_pad * n_pad * itemsize + x_bytes
                      + 2 * Fin * Fpad * itemsize + 3 * Fpad * 4
                      + B * n_pad * Fout * out_itemsize)
    cost = pl.CostEstimate(flops=int(flops), transcendentals=int(B * n_pad),
                           bytes_accessed=int(bytes_accessed))

    # Always set the VMEM limit: capped below physical capacity (v7x = 64 MiB)
    # with headroom, and never below the largest default scoped limit.
    headroom = 8 << 20
    vlimit = int(min(max(vmem_cap - headroom, 16 << 20),
                     max(vmem_est + (16 << 20), 32 << 20)))
    cparams = pltpu.CompilerParams(
        dimension_semantics=("parallel", "parallel", "arbitrary"),
        vmem_limit_bytes=vlimit)

    out = pl.pallas_call(
        kernel,
        out_shape=jax.ShapeDtypeStruct((B, n_pad, Fout), out_dtype),
        grid_spec=grid_spec,
        compiler_params=cparams,
        cost_estimate=cost,
    )(adj_c, *x_args, w_p, wr_p, bias_p, gamma_p, beta_p)

    return out[:, :N, :] if n_pad != N else out


def _reference_mixed(x, adj, weight, bias, wres_t, gamma, beta,
                     compute_dtype=jnp.bfloat16, eps=1e-5):
    """Mirrors the kernel's support-first mixed precision numerics."""
    f32 = jnp.float32
    xc = x.astype(compute_dtype).astype(f32)
    ac = adj.astype(compute_dtype).astype(f32)
    w = weight.astype(compute_dtype).astype(f32)
    wr = wres_t.astype(compute_dtype).astype(f32)
    support = jnp.einsum("bnf,fo->bno", xc, w)
    support = support.astype(compute_dtype).astype(f32)
    out = jnp.einsum("bnm,bmo->bno", ac, support) + bias
    out = out + jnp.einsum("bnf,fo->bno", xc, wr)
    mean = jnp.mean(out, axis=-1, keepdims=True)
    var = jnp.mean((out - mean) ** 2, axis=-1, keepdims=True)
    return (out - mean) * jax.lax.rsqrt(var + eps) * gamma + beta


def _reference_f32(x, adj, weight, bias, wres_t, gamma, beta, eps=1e-5):
    """Exact f32 reference of the PyTorch module's forward."""
    support = jnp.einsum("bnf,fo->bno", x, weight)
    out = jnp.einsum("bnm,bmo->bno", adj, support) + bias
    out = out + jnp.einsum("bnf,fo->bno", x, wres_t)
    mean = jnp.mean(out, axis=-1, keepdims=True)
    var = jnp.mean((out - mean) ** 2, axis=-1, keepdims=True)
    return (out - mean) * jax.lax.rsqrt(var + eps) * gamma + beta


if __name__ == "__main__":
    # Small shapes consistent with the module's forward.
    B, N = 2, 16
    Fin, Fout = 8, 32  # in_features != out_features -> residual projection path

    key = jax.random.PRNGKey(0)
    k_x, k_adj, k_w, k_res = jax.random.split(key, 4)

    x = jax.random.normal(k_x, (B, N, Fin), dtype=jnp.float32)
    adj_raw = jax.random.uniform(k_adj, (B, N, N), dtype=jnp.float32)
    adj = adj_raw / jnp.sum(adj_raw, axis=-1, keepdims=True)  # row-normalized

    # Xavier uniform init for weight, zero bias (matches the module init).
    a = (6.0 / (Fin + Fout)) ** 0.5
    weight = jax.random.uniform(k_w, (Fin, Fout), minval=-a, maxval=a,
                                dtype=jnp.float32)
    bias = jnp.zeros((Fout,), dtype=jnp.float32)

    # residual_proj: nn.Linear(Fin, Fout, bias=False); passed pre-transposed.
    a_res = (1.0 / Fin) ** 0.5
    wres_t = jax.random.uniform(k_res, (Fin, Fout), minval=-a_res, maxval=a_res,
                                dtype=jnp.float32)

    gamma = jnp.ones((Fout,), dtype=jnp.float32)
    beta = jnp.zeros((Fout,), dtype=jnp.float32)

    out = enhanced_graph_conv(x, adj, weight, bias, wres_t, gamma, beta)
    out = jax.block_until_ready(out)
    assert out.shape == (B, N, Fout)
    assert out.dtype == jnp.float32

    ref_mixed = _reference_mixed(x, adj, weight, bias, wres_t, gamma, beta)
    ref_f32 = _reference_f32(x, adj, weight, bias, wres_t, gamma, beta)
    assert jnp.allclose(out, ref_mixed, atol=2e-3, rtol=2e-3), \
        "mismatch vs bf16-path reference"
    assert jnp.allclose(out, ref_f32, atol=5e-2, rtol=5e-2), \
        "mismatch vs f32 reference"

    print("KERNEL_OK")
</pallas_src>

<mosaic_0001>
module attributes {stable_mosaic.version = 11 : i64} {
  func.func @kernel(%arg0: i32, %arg1: i32, %arg2: i32, %arg3: memref<2x16x16xbf16, #tpu.memory_space<vmem>>, %arg4: memref<2x16x8xbf16, #tpu.memory_space<vmem>>, %arg5: memref<8x128xbf16, #tpu.memory_space<vmem>>, %arg6: memref<8x128xbf16, #tpu.memory_space<vmem>>, %arg7: memref<1x128xf32, #tpu.memory_space<vmem>>, %arg8: memref<1x128xf32, #tpu.memory_space<vmem>>, %arg9: memref<1x128xf32, #tpu.memory_space<vmem>>, %arg10: memref<2x16x32xf32, #tpu.memory_space<vmem>>, %arg11: memref<2x16x128xf32, #tpu.memory_space<vmem>>) attributes {dimension_semantics = [#tpu.dimension_semantics<parallel>, #tpu.dimension_semantics<parallel>, #tpu.dimension_semantics<arbitrary>], iteration_bounds = array<i64: 1, 1, 1>, scalar_prefetch = 0 : i64, scratch_operands = 1 : i64, tpu.core_type = #tpu.core_type<tc>, window_params = [{transform_indices = @transform_0, window_bounds = array<i64: 2, 16, 16>}, {transform_indices = @transform_1, window_bounds = array<i64: 2, 16, 8>}, {pipeline_mode = #tpu.pipeline_mode<synchronous>, transform_indices = @transform_2, window_bounds = array<i64: 8, 128>}, {pipeline_mode = #tpu.pipeline_mode<synchronous>, transform_indices = @transform_3, window_bounds = array<i64: 8, 128>}, {pipeline_mode = #tpu.pipeline_mode<synchronous>, transform_indices = @transform_4, window_bounds = array<i64: 1, 128>}, {pipeline_mode = #tpu.pipeline_mode<synchronous>, transform_indices = @transform_5, window_bounds = array<i64: 1, 128>}, {pipeline_mode = #tpu.pipeline_mode<synchronous>, transform_indices = @transform_6, window_bounds = array<i64: 1, 128>}, {transform_indices = @transform_7, window_bounds = array<i64: 2, 16, 32>}]} {
    %c0_i32 = arith.constant 0 : i32
    %0 = arith.cmpi eq, %arg2, %c0_i32 : i32
    %1 = arith.extui %0 : i1 to i32
    %c0_i32_0 = arith.constant 0 : i32
    %2 = arith.cmpi ne, %1, %c0_i32_0 : i32
    scf.if %2 {
      %cst_17 = arith.constant 0.000000e+00 : f32
      %15 = vector.broadcast %cst_17 : f32 to vector<2x16x128xf32>
      %c0_18 = arith.constant 0 : index
      %c0_19 = arith.constant 0 : index
      %c0_20 = arith.constant 0 : index
      %16 = vector.load %arg11[%c0_18, %c0_19, %c0_20] : memref<2x16x128xf32, #tpu.memory_space<vmem>>, vector<2x16x128xf32>
      tpu.vector_store %arg11[%c0_18, %c0_19, %c0_20], %15 {strides = array<i32>} : memref<2x16x128xf32, #tpu.memory_space<vmem>>, vector<2x16x128xf32>,
    } else {
    }
    %c0 = arith.constant 0 : index
    %c0_1 = arith.constant 0 : index
    %c0_2 = arith.constant 0 : index
    %3 = vector.load %arg4[%c0, %c0_1, %c0_2] : memref<2x16x8xbf16, #tpu.memory_space<vmem>>, vector<2x16x8xbf16>
    %c0_3 = arith.constant 0 : index
    %c0_4 = arith.constant 0 : index
    %c0_5 = arith.constant 0 : index
    %4 = vector.load %arg3[%c0_3, %c0_4, %c0_5] : memref<2x16x16xbf16, #tpu.memory_space<vmem>>, vector<2x16x16xbf16>
    %c0_6 = arith.constant 0 : index
    %c0_7 = arith.constant 0 : index
    %5 = vector.load %arg5[%c0_6, %c0_7] : memref<8x128xbf16, #tpu.memory_space<vmem>>, vector<8x128xbf16>
    "tpu.trace_start"() <{level = 10 : i32, message = "bmf,fo->bmo"}> : () -> ()
    %cst = arith.constant dense<0.000000e+00> : vector<2x16x128xf32>
    %6 = tpu.matmul %3, %5, %cst {dimension_numbers = #tpu.dot_dimension_numbers<[2], [0], [0, 1], [1], [0, 0, 0, 1, 1, 1], [], []>} : vector<2x16x8xbf16>, vector<8x128xbf16>, vector<2x16x128xf32> -> vector<2x16x128xf32>
    "tpu.trace_stop"() : () -> ()
    %7 = arith.truncf %6 : vector<2x16x128xf32> to vector<2x16x128xbf16>
    %c0_8 = arith.constant 0 : index
    %c0_9 = arith.constant 0 : index
    %c0_10 = arith.constant 0 : index
    %8 = vector.load %arg11[%c0_8, %c0_9, %c0_10] : memref<2x16x128xf32, #tpu.memory_space<vmem>>, vector<2x16x128xf32>
    "tpu.trace_start"() <{level = 10 : i32, message = "bnm,bmo->bno"}> : () -> ()
    %cst_11 = arith.constant dense<0.000000e+00> : vector<2x16x128xf32>
    %9 = tpu.matmul %4, %7, %cst_11 {dimension_numbers = #tpu.dot_dimension_numbers<[2], [1], [1], [2], [0, 0, 0, 1, 1, 2], [0], [0]>} : vector<2x16x16xbf16>, vector<2x16x128xbf16>, vector<2x16x128xf32> -> vector<2x16x128xf32>
    "tpu.trace_stop"() : () -> ()
    %10 = arith.addf %8, %9 : vector<2x16x128xf32>
    %c0_12 = arith.constant 0 : index
    %c0_13 = arith.constant 0 : index
    %c0_14 = arith.constant 0 : index
    %11 = vector.load %arg11[%c0_12, %c0_13, %c0_14] : memref<2x16x128xf32, #tpu.memory_space<vmem>>, vector<2x16x128xf32>
    tpu.vector_store %arg11[%c0_12, %c0_13, %c0_14], %10 {strides = array<i32>} : memref<2x16x128xf32, #tpu.memory_space<vmem>>, vector<2x16x128xf32>,
    %c0_i32_15 = arith.constant 0 : i32
    %12 = arith.cmpi eq, %arg2, %c0_i32_15 : i32
    %13 = arith.extui %12 : i1 to i32
    %c0_i32_16 = arith.constant 0 : i32
    %14 = arith.cmpi ne, %13, %c0_i32_16 : i32
    scf.if %14 {
      %c0_17 = arith.constant 0 : index
      %c0_18 = arith.constant 0 : index
      %c0_19 = arith.constant 0 : index
      %15 = vector.load %arg4[%c0_17, %c0_18, %c0_19] : memref<2x16x8xbf16, #tpu.memory_space<vmem>>, vector<2x16x8xbf16>
      %16 = vector.shape_cast %15 : vector<2x16x8xbf16> to vector<32x8xbf16>
      %c0_20 = arith.constant 0 : index
      %c0_21 = arith.constant 0 : index
      %17 = vector.load %arg6[%c0_20, %c0_21] : memref<8x128xbf16, #tpu.memory_space<vmem>>, vector<8x128xbf16>
      %cst_22 = arith.constant dense<0.000000e+00> : vector<32x128xf32>
      %18 = tpu.matmul %16, %17, %cst_22 {dimension_numbers = #tpu.dot_dimension_numbers<[1], [0], [0], [1], [0, 0, 1, 1], [], []>} : vector<32x8xbf16>, vector<8x128xbf16>, vector<32x128xf32> -> vector<32x128xf32>
      %c0_23 = arith.constant 0 : index
      %c0_24 = arith.constant 0 : index
      %c0_25 = arith.constant 0 : index
      %19 = vector.load %arg11[%c0_23, %c0_24, %c0_25] : memref<2x16x128xf32, #tpu.memory_space<vmem>>, vector<2x16x128xf32>
      %20 = vector.shape_cast %19 : vector<2x16x128xf32> to vector<32x128xf32>
      %21 = arith.addf %20, %18 : vector<32x128xf32>
      %c0_26 = arith.constant 0 : index
      %c0_27 = arith.constant 0 : index
      %22 = vector.load %arg7[%c0_26, %c0_27] : memref<1x128xf32, #tpu.memory_space<vmem>>, vector<1x128xf32>
      %23 = vector.broadcast %22 : vector<1x128xf32> to vector<32x128xf32>
      %24 = arith.addf %21, %23 : vector<32x128xf32>
      %25 = tpu.iota {dimensions = array<i32: 1>} : vector<1x128xi32>
      %c32_i32 = arith.constant 32 : i32
      %26 = vector.broadcast %c32_i32 : i32 to vector<1x128xi32>
      %27 = arith.cmpi slt, %25, %26 : vector<1x128xi32>
      %28 = arith.extui %27 : vector<1x128xi1> to vector<1x128xi32>
      %29 = arith.sitofp %28 : vector<1x128xi32> to vector<1x128xf32>
      %30 = vector.broadcast %29 : vector<1x128xf32> to vector<32x128xf32>
      %31 = arith.mulf %24, %30 : vector<32x128xf32>
      %cst_28 = arith.constant dense<0.000000e+00> : vector<32xf32>
      %32 = vector.multi_reduction <add>, %31, %cst_28 [1] : vector<32x128xf32> to vector<32xf32>
      %33 = vector.shape_cast %32 : vector<32xf32> to vector<32x1xf32>
      %cst_29 = arith.constant 3.125000e-02 : f32
      %34 = vector.broadcast %cst_29 : f32 to vector<32x1xf32>
      %35 = arith.mulf %33, %34 : vector<32x1xf32>
      %36 = vector.broadcast %35 : vector<32x1xf32> to vector<32x128xf32>
      %37 = arith.subf %31, %36 : vector<32x128xf32>
      %38 = vector.broadcast %29 : vector<1x128xf32> to vector<32x128xf32>
      %39 = arith.mulf %37, %38 : vector<32x128xf32>
      %40 = arith.mulf %39, %39 : vector<32x128xf32>
      %cst_30 = arith.constant dense<0.000000e+00> : vector<32xf32>
      %41 = vector.multi_reduction <add>, %40, %cst_30 [1] : vector<32x128xf32> to vector<32xf32>
      %42 = vector.shape_cast %41 : vector<32xf32> to vector<32x1xf32>
      %cst_31 = arith.constant 3.125000e-02 : f32
      %43 = vector.broadcast %cst_31 : f32 to vector<32x1xf32>
      %44 = arith.mulf %42, %43 : vector<32x1xf32>
      %cst_32 = arith.constant 9.99999974E-6 : f32
      %45 = vector.broadcast %cst_32 : f32 to vector<32x1xf32>
      %46 = arith.addf %44, %45 : vector<32x1xf32>
      %47 = math.rsqrt %46 : vector<32x1xf32>
      %48 = vector.broadcast %47 : vector<32x1xf32> to vector<32x128xf32>
      %49 = arith.mulf %39, %48 : vector<32x128xf32>
      %c0_33 = arith.constant 0 : index
      %c0_34 = arith.constant 0 : index
      %50 = vector.load %arg8[%c0_33, %c0_34] : memref<1x128xf32, #tpu.memory_space<vmem>>, vector<1x128xf32>
      %51 = vector.broadcast %50 : vector<1x128xf32> to vector<32x128xf32>
      %52 = arith.mulf %49, %51 : vector<32x128xf32>
      %c0_35 = arith.constant 0 : index
      %c0_36 = arith.constant 0 : index
      %53 = vector.load %arg9[%c0_35, %c0_36] : memref<1x128xf32, #tpu.memory_space<vmem>>, vector<1x128xf32>
      %54 = vector.broadcast %53 : vector<1x128xf32> to vector<32x128xf32>
      %55 = arith.addf %52, %54 : vector<32x128xf32>
      %56 = vector.extract_strided_slice %55 {offsets = [0, 0], sizes = [32, 32], strides = [1, 1]} : vector<32x128xf32> to vector<32x32xf32>
      %57 = vector.shape_cast %56 : vector<32x32xf32> to vector<2x16x32xf32>
      %c0_37 = arith.constant 0 : index
      %c0_38 = arith.constant 0 : index
      %c0_39 = arith.constant 0 : index
      %58 = vector.load %arg10[%c0_37, %c0_38, %c0_39] : memref<2x16x32xf32, #tpu.memory_space<vmem>>, vector<2x16x32xf32>
      tpu.vector_store %arg10[%c0_37, %c0_38, %c0_39], %57 {strides = array<i32>} : memref<2x16x32xf32, #tpu.memory_space<vmem>>, vector<2x16x32xf32>,
    } else {
    }
    return
  }
  func.func @transform_0(%arg0: i32, %arg1: i32, %arg2: i32) -> (i32, i32, i32) {
    %c0_i32 = arith.constant 0 : i32
    return %arg0, %arg1, %arg2 : i32, i32, i32
  }
  func.func @transform_1(%arg0: i32, %arg1: i32, %arg2: i32) -> (i32, i32, i32) {
    %c0_i32 = arith.constant 0 : i32
    %c0_i32_0 = arith.constant 0 : i32
    %c0_i32_1 = arith.constant 0 : i32
    return %arg0, %c0_i32, %c0_i32_0 : i32, i32, i32
  }
  func.func @transform_2(%arg0: i32, %arg1: i32, %arg2: i32) -> (i32, i32) {
    %c0_i32 = arith.constant 0 : i32
    %c0_i32_0 = arith.constant 0 : i32
    %c0_i32_1 = arith.constant 0 : i32
    return %c0_i32, %c0_i32_0 : i32, i32
  }
  func.func @transform_3(%arg0: i32, %arg1: i32, %arg2: i32) -> (i32, i32) {
    %c0_i32 = arith.constant 0 : i32
    %c0_i32_0 = arith.constant 0 : i32
    %c0_i32_1 = arith.constant 0 : i32
    return %c0_i32, %c0_i32_0 : i32, i32
  }
  func.func @transform_4(%arg0: i32, %arg1: i32, %arg2: i32) -> (i32, i32) {
    %c0_i32 = arith.constant 0 : i32
    %c0_i32_0 = arith.constant 0 : i32
    %c0_i32_1 = arith.constant 0 : i32
    return %c0_i32, %c0_i32_0 : i32, i32
  }
  func.func @transform_5(%arg0: i32, %arg1: i32, %arg2: i32) -> (i32, i32) {
    %c0_i32 = arith.constant 0 : i32
    %c0_i32_0 = arith.constant 0 : i32
    %c0_i32_1 = arith.constant 0 : i32
    return %c0_i32, %c0_i32_0 : i32, i32
  }
  func.func @transform_6(%arg0: i32, %arg1: i32, %arg2: i32) -> (i32, i32) {
    %c0_i32 = arith.constant 0 : i32
    %c0_i32_0 = arith.constant 0 : i32
    %c0_i32_1 = arith.constant 0 : i32
    return %c0_i32, %c0_i32_0 : i32, i32
  }
  func.func @transform_7(%arg0: i32, %arg1: i32, %arg2: i32) -> (i32, i32, i32) {
    %c0_i32 = arith.constant 0 : i32
    %c0_i32_0 = arith.constant 0 : i32
    return %arg0, %arg1, %c0_i32 : i32, i32, i32
  }
}

</mosaic_0001>

<bundles_post_ra>
// kernel: tpu_custom_call.1
= control target key start
LH: loop header
LB: loop body
LE: loop exit
PB: predicated region body
PF: predicated region fallthrough
CT: control target
= control target key end

     0   :  { %vm62_vm0 = vcmask 1043456   ;;  %vm55_vm1 = vcmask 64512   ;;  %s620_s0 = inlined_call_operand.vmem [shape: bf16[2,16,16], index: 0, kind: input, shape index: {}]   ;;  %s621_s1 = inlined_call_operand.vmem [shape: bf16[2,16,8], index: 1, kind: input, shape index: {}]   ;;  %s622_s2 = inlined_call_operand.vmem [shape: bf16[8,128], index: 2, kind: input, shape index: {}]   ;;  %s623_s3 = inlined_call_operand.vmem [shape: bf16[8,128], index: 3, kind: input, shape index: {}]   ;;  %s624_s4 = inlined_call_operand.vmem [shape: f32[1,128], index: 4, kind: input, shape index: {}]   ;;  %s625_s5 = inlined_call_operand.vmem [shape: f32[1,128], index: 5, kind: input, shape index: {}]   ;;  %s626_s6 = inlined_call_operand.vmem [shape: f32[1,128], index: 6, kind: input, shape index: {}]   ;;  %s627_s7 = inlined_call_operand.hbm [shape: f32[2,16,32], index: 7, kind: output, shape index: {}]  }
   0x1   :  { %v44_v0 = vld [vmem:[%s622_s2] sm:$0xf]  ;;  %v481_v3 = vld [vmem:[%s621_s1 + $0x8] sm:$0xff]  }
   0x2   :  { %v480_v1 = vld [vmem:[%s621_s1] sm:$0xff]   ;;  %473 = vmatprep.subr.msk.bf16.mxu0 %vm62_vm0, %v44_v0  ;;  %v64_v2 = vsel %vm62_vm0, %v44_v0, 0 }
   0x3   :  { %450 = vmatpush3.bf16.msra.mxu0 %v64_v2  ;;  %451 = vmatprep.mubr.msk.bf16.mxu0 %vm55_vm1, %v480_v1 }
   0x6   :  { %452 = vmatmul.mubr.msk.bf16.vlgmr.msra.gmra.mrb[0].mxu0 %vm55_vm1, %v481_v3 }
   0x7   :  { %12 = vsyncpa [#allocation4], 0  ;;  %v518_v4 = vmov 0.0   ;;  %vm519_vm2 = vmmov 0   ;;  %v235_v11 = vld [vmem:[%s623_s3] sm:$0xf]  ;;  %v323_v17 = vlaneseq }
   0x8   :  { %461 = vmatprep.subr.bf16.mxu0 %v518_v4  ;;  %455 = vmatprep.subr.bf16.mxu1 %v518_v4  ;;  %v484_v12 = vld [vmem:[%s620_s0 + $0x8] sm:$0xff]   ;;  %v482_v13 = vld [vmem:[%s620_s0] sm:$0xff]   ;;  %vm126_vm3 = vcmask 130048   ;;  %v253_v15 = vsel %vm62_vm0, %v235_v11, 0  ;;  %vm402_vm5 = vcmask 261120  }
   0x9   :  { %457 = vmatprep.mubr.msk.bf16.mxu1 %vm519_vm2, %v518_v4  ;;  %463 = vmatprep.mubr.msk.bf16.mxu0 %vm519_vm2, %v518_v4  ;;  %v483_v14 = vld [vmem:[%s621_s1] sm:$0xff]   ;;  %v485_v16 = vld [vmem:[%s621_s1 + $0x8] sm:$0xff]   ;;  %v324_v25 = vand.u32 127, %v323_v17 }
   0xa   :  { %v435_v28 = vld [vmem:[%s624_s4] ss:$0 sm:$0xff] }
   0xb   :  { %vm325_vm4 = vcmp.lt.s32.totalorder %v324_v25, 32 }
   0xc   :  { %v436_v31 = vsel %vm325_vm4, 1.0, %v518_v4 }
  0xd9   :  { %v453_v5 = vpop.f32.mrb[0].mxu0 }
  0xda   :  { %v100_v6 = vpop.f32.mrb[1].mxu0 }
  0xdb   :  { %v454_v7 = vpop.f32.mrb[2].mxu0 }
  0xdc   :  { %v116_v8 = vpack.c.bf16 %v454_v7, %v453_v5  ;;  %v103_v9 = vpop.f32.mrb[3].mxu0 }
  0xdd   :  { %v115_v10 = vpack.c.bf16 %v103_v9, %v100_v6 }
  0xde   :  { %462 = vmatpush3.bf16.msra.mxu0 %v116_v8 }
  0xdf   :  { %456 = vmatpush3.bf16.msra.mxu1 %v115_v10 }
  0xe0   :  { %474 = vmatprep.subr.msk.bf16.mxu1 %vm62_vm0, %v235_v11 }
  0xe1   :  { %464 = vmatmul.mubr.msk.bf16.vlgmr.msra.gmra.mrb[4].mxu0 %vm126_vm3, %v484_v12 }
  0xe2   :  { %458 = vmatmul.mubr.msk.bf16.vlgmr.msra.gmra.mrb[0].mxu1 %vm126_vm3, %v482_v13 }
  0xe3   :  { %468 = vmatpush3.bf16.msra.mxu1 %v253_v15  ;;  %469 = vmatprep.mubr.msk.bf16.mxu1 %vm55_vm1, %v483_v14  ;;  %v437_v14 = vld [vmem:[%s625_s5] ss:$0 sm:$0xff]  ;;  %s520_s5 = smov [#allocation3]  }
  0xe4   :  { %s412_s18 = sshll.u32 %s520_s5, 4  ;;  %s413_s18 = int_to_ptr.vmem [resolvable:$true] %s412_s18 }
  0xe5   :  { %p499_p1 = scmp.lt.s32.totalorder %s413_s18, %s413_s18 }
  0xea   :  { %470 = vmatmul.mubr.msk.bf16.vlgmr.msra.gmra.mrb[4].mxu1 %vm55_vm1, %v485_v16  ;;  %v438_v16 = vld [vmem:[%s626_s6] ss:$0 sm:$0xff]  ;;  %s494_s6 = scalar_lea.vmem %s413_s18, 512 }
  0xeb   :  { %p495_p0 = scmp.ne.s32.totalorder %s413_s18, %s494_s6  ;;  %p500_p2 = scmp.lt.s32.totalorder %s494_s6, %s494_s6 }
  0xed   :  { %p501_p3 = por %p500_p2, %p499_p1 }
  0xef   :  { %p502_p4 = pnand %p501_p3, %p495_p0 }
 0x1b4   :  { %v213_v18 = vpop.f32.mrb[4].mxu0 }
 0x1b5   :  { %v164_v19 = vpop.f32.mrb[0].mxu1  ;;  %v465_v20 = vpop.f32.mrb[5].mxu0 }
 0x1b6   :  { %v459_v21 = vpop.f32.mrb[1].mxu1  ;;  %v216_v22 = vpop.f32.mrb[6].mxu0 }
 0x1b7   :  { %v167_v23 = vpop.f32.mrb[2].mxu1  ;;  %v466_v24 = vpop.f32.mrb[7].mxu0 }
 0x1b8   :  { %v460_v26 = vpop.f32.mrb[3].mxu1 }
 0x1bd   :  { %v471_v27 = vpop.f32.mrb[4].mxu1 }
 0x1be   :  { %v310_v29 = vadd.f32 %v471_v27, %v213_v18  ;;  %v289_v30 = vpop.f32.mrb[5].mxu1 }
 0x1bf   :  { %v308_v32 = vadd.f32 %v289_v30, %v164_v19  ;;  %v472_v33 = vpop.f32.mrb[6].mxu1 }
 0x1c0   :  { %v321_v34 = vadd.f32 %v435_v28, %v310_v29  ;;  %v311_v35 = vadd.f32 %v472_v33, %v216_v22  ;;  %v292_v36 = vpop.f32.mrb[7].mxu1 }
 0x1c1   :  { %v319_v37 = vadd.f32 %v435_v28, %v308_v32  ;;  %v309_v38 = vadd.f32 %v292_v36, %v167_v23 }
 0x1c2   :  { %v322_v39 = vadd.f32 %v435_v28, %v311_v35  ;;  %v330_v40 = vmul.f32 %v436_v31, %v321_v34 }
 0x1c3   :  { %v320_v41 = vadd.f32 %v435_v28, %v309_v38  ;;  %v328_v42 = vmul.f32 %v436_v31, %v319_v37 }
 0x1c4   :  { %336 = vadd.xlane.f32.xlu1 %v330_v40  ;;  %v331_v43 = vmul.f32 %v436_v31, %v322_v39 }
 0x1c5   :  { %332 = vadd.xlane.f32.xlu0 %v328_v42  ;;  %v329_v44 = vmul.f32 %v436_v31, %v320_v41 }
 0x1c8   :  { %338 = vadd.xlane.f32.xlu1 %v331_v43 }
 0x1c9   :  { %334 = vadd.xlane.f32.xlu0 %v329_v44 }
 0x251   :  { %v337_v45 = vpop.xlane.xlu1 %336 }
 0x252   :  { %v342_v46 = vmul.f32 0.03125, %v337_v45  ;;  %v333_v47 = vpop.xlane.xlu0 %332 }
 0x253   :  { %v340_v48 = vmul.f32 0.03125, %v333_v47 }
 0x254   :  { %v346_v49 = vsub.f32 %v330_v40, %v342_v46 }
 0x255   :  { %v344_v50 = vsub.f32 %v328_v42, %v340_v48  ;;  %v339_v51 = vpop.xlane.xlu1 %338 }
 0x256   :  { %v343_v52 = vmul.f32 0.03125, %v339_v51  ;;  %v335_v53 = vpop.xlane.xlu0 %334  ;;  %v350_v59 = vmul.f32 %v436_v31, %v346_v49 }
 0x257   :  { %v341_v54 = vmul.f32 0.03125, %v335_v53  ;;  %v348_v55 = vmul.f32 %v436_v31, %v344_v50 }
 0x258   :  { %v347_v56 = vsub.f32 %v331_v43, %v343_v52  ;;  %v354_v61 = vmul.f32 %v350_v59, %v350_v59 }
 0x259   :  { %v345_v57 = vsub.f32 %v329_v44, %v341_v54  ;;  %v352_v58 = vmul.f32 %v348_v55, %v348_v55 }
 0x25a   :  { %v351_v63 = vmul.f32 %v436_v31, %v347_v56 }
 0x25b   :  { %356 = vadd.xlane.f32.xlu0 %v352_v58  ;;  %v349_v60 = vmul.f32 %v436_v31, %v345_v57 }
 0x25c   :  { %v355_v0 = vmul.f32 %v351_v63, %v351_v63 }
 0x25d   :  { %v353_v62 = vmul.f32 %v349_v60, %v349_v60 }
 0x25f   :  { %360 = vadd.xlane.f32.xlu0 %v354_v61  ;;  %358 = vadd.xlane.f32.xlu1 %v353_v62 }
 0x263   :  { %362 = vadd.xlane.f32.xlu1 %v355_v0 }
 0x2e8   :  { %v357_v1 = vpop.xlane.xlu0 %356 }
 0x2e9   :  { %v364_v2 = vmul.f32 0.03125, %v357_v1 }
 0x2eb   :  { %v368_v3 = vadd.f32 1e-05, %v364_v2 }
 0x2ec   :  { %v359_v4 = vpop.xlane.xlu1 %358  ;;  %v361_v5 = vpop.xlane.xlu0 %360 }
 0x2ed   :  { %486 = vrsqrt.f32 %v368_v3  ;;  %v365_v6 = vmul.f32 0.03125, %v359_v4  ;;  %v366_v7 = vmul.f32 0.03125, %v361_v5 }
 0x2ef   :  { %v369_v8 = vadd.f32 1e-05, %v365_v6  ;;  %v370_v9 = vadd.f32 1e-05, %v366_v7 }
 0x2f0   :  { %v363_v10 = vpop.xlane.xlu1 %362 }
 0x2f1   :  { %488 = vrsqrt.f32 %v369_v8  ;;  %v367_v11 = vmul.f32 0.03125, %v363_v10 }
 0x2f2   :  { %490 = vrsqrt.f32 %v370_v9 }
 0x2f3   :  { %v371_v12 = vadd.f32 1e-05, %v367_v11 }
 0x2f5   :  { %492 = vrsqrt.f32 %v371_v12 }
 0x2f7   :  { %v487_v13 = vpop.eup %486 }
 0x2f8   :  { %v376_v15 = vmul.f32 %v487_v13, %v348_v55 }
 0x2fa   :  { %v387_v17 = vmul.f32 %v437_v14, %v376_v15 }
 0x2fb   :  { %v489_v18 = vpop.eup %488 }
 0x2fc   :  { %v491_v19 = vpop.eup %490  ;;  %v398_v20 = vadd.f32 %v438_v16, %v387_v17  ;;  %v377_v21 = vmul.f32 %v489_v18, %v349_v60 }
 0x2fd   :  { %v378_v22 = vmul.f32 %v491_v19, %v350_v59 }
 0x2fe   :  { %v388_v23 = vmul.f32 %v437_v14, %v377_v21  ;;  %403 = vst.msk [vmem:[#allocation3] sm:$0xff] %vm402_vm5, %v398_v20 }
 0x2ff   :  { %v493_v24 = vpop.eup %492  ;;  %v389_v25 = vmul.f32 %v437_v14, %v378_v22 }
 0x300   :  { %v399_v26 = vadd.f32 %v438_v16, %v388_v23  ;;  %v379_v27 = vmul.f32 %v493_v24, %v351_v63 }
 0x301   :  { %v400_v28 = vadd.f32 %v438_v16, %v389_v25 }
 0x302   :  { %v390_v29 = vmul.f32 %v437_v14, %v379_v27  ;;  %404 = vst.msk [vmem:[#allocation3 + $0x8] sm:$0xff] %vm402_vm5, %v399_v26 }
 0x303   :  { %405 = vst.msk [vmem:[#allocation3 + $0x10] sm:$0xff] %vm402_vm5, %v400_v28 }
 0x304   :  { %v401_v30 = vadd.f32 %v438_v16, %v390_v29 }
 0x306   :  { %406 = vst.msk [vmem:[#allocation3 + $0x18] sm:$0xff] %vm402_vm5, %v401_v30 }
 0x307   :  { %505 = shalt.err (!%p502_p4)
}
 0x308   :  { %s506_s21 = scalar_lea.hbm %s627_s7, 512 }
 0x309   :  { %p507_p5 = scmp.ne.s32.totalorder %s627_s7, %s506_s21  ;;  %p510_p6 = scmp.lt.u32.totalorder %s506_s21, %s627_s7 }
 0x30b   :  { %p512_p7 = pnand %p510_p6, %p507_p5 }
 0x30d   :  { %515 = shalt.err (!%p512_p7)
}
 0x30e   :  { %s521_s26 = smov 128   ;;  %s522_s27 = smov 8  }
 0x30f   :  { %418 = dma.vmem_to_hbm [thread:$0]  %s413_s18, 512, %s627_s7, [#allocation4], %s521_s26, %s521_s26, %s522_s27  }
 0x310   :  { %516 = dma.done.wait [#allocation4], 512  }
 0x311   :  { %517 = vsyncadd [#allocation4], 4294966784 }
 0x312   :  { %422 = vsyncpa [#allocation4], 1 }

</bundles_post_ra>
